<compile_context>
chip_gen: v5e
topology: v5e:2x2
jax: 0.10.0
libtpu: 0.0.40
codegen_flags: <defaults>
</compile_context>

<pallas_src>
import numpy as np
import jax
import jax.numpy as jnp
from jax import lax
from jax.experimental import pallas as pl
from jax.experimental.pallas import tpu as pltpu

BN_EPS = 1e-5
SUBLANE = 8


def _round_up(x, m):
    return (x + m - 1) // m * m


# ---------------------------------------------------------------------------
# Fused kernel: one grid step == one STGPBlock.  out_ref is the resident state.
# ---------------------------------------------------------------------------
def stgp_fused_kernel(x0_ref, ga_ref, mrow_ref, w_ref, vec_ref, out_ref):
    blk = pl.program_id(0)

    # Step 0: seed the resident state (the output block, constant index_map).
    @pl.when(blk == 0)
    def _():
        out_ref[...] = x0_ref[...]

    ga = ga_ref[0]                       # [2, Np, Np] f32: one-hot sel / adj
    sel, adj = ga[0], ga[1]
    mr = mrow_ref[0]                     # [Np, 2] f32: (mask, mask / n_valid)
    mask, maskw = mr[:, 0:1], mr[:, 1:2]
    w = w_ref[0]                         # [3, F, F] pre-transposed ([F_in,F_out])
    vecs = vec_ref[0]                    # [8, F] f32 packed per-channel vectors
    bp, bg, bt = vecs[0:1, :], vecs[1:2, :], vecs[2:3, :]
    gamma, beta = vecs[3:4, :], vecs[4:5, :]
    mx_dt = w.dtype                      # f32 or bf16 (MXU dtype for Linears)

    # Graph downsample  x = x[downsampled_nodes]  : exact one-hot gather (f32).
    x = jnp.dot(sel, out_ref[...], preferred_element_type=jnp.float32)

    # input_projection: Linear(F, F)
    x_proj = jnp.dot(x.astype(mx_dt), w[0],
                     preferred_element_type=jnp.float32) + bp

    # graph_conv: relu(Linear(adj @ x_proj))    (adj matmul kept in f32)
    h = jnp.dot(adj, x_proj, preferred_element_type=jnp.float32)
    h = jnp.maximum(
        jnp.dot(h.astype(mx_dt), w[1], preferred_element_type=jnp.float32) + bg,
        0.0)

    # temporal_conv: Conv1d(F, F, kernel_size=1)  ==  h @ Wt^T + bt
    y = jnp.dot(h.astype(mx_dt), w[2], preferred_element_type=jnp.float32) + bt

    # BatchNorm1d (training mode) over the valid nodes — single pass, f32.
    mean = jnp.sum(y * maskw, axis=0, keepdims=True)
    var = jnp.sum(y * y * maskw, axis=0, keepdims=True) - mean * mean
    y = (y - mean) * lax.rsqrt(jnp.maximum(var, 0.0) + BN_EPS)
    y = y * gamma + beta

    # Residual; mask keeps padded rows exactly zero for the next block.
    out_ref[...] = (y + x_proj) * mask


# ---------------------------------------------------------------------------
# Host wrapper: packs parameters / graph data at true size, one fused call.
# ---------------------------------------------------------------------------
def stgp_network_forward(x, block_params, pyramid, weight_dtype=jnp.bfloat16):
    pyramid.reset()
    n0, f = x.shape
    nb = len(block_params)
    n_pad = _round_up(max(n0, SUBLANE), SUBLANE)

    # Per-block graph data: [sel | adj] stack + row mask / (mask / n_valid).
    gas = np.zeros((nb, 2, n_pad, n_pad), np.float32)
    mrows = np.zeros((nb, n_pad, 2), np.float32)
    n_last = n0
    for b in range(nb):
        local_idx, adj_np = pyramid.downsample()
        n_b = len(local_idx)
        gas[b, 0, np.arange(n_b), np.asarray(local_idx)] = 1.0   # one-hot sel
        gas[b, 1, :n_b, :n_b] = adj_np                           # induced adj
        mrows[b, :n_b, 0] = 1.0
        mrows[b, :n_b, 1] = 1.0 / n_b
        n_last = n_b

    # True-size weight stack (pre-transposed to [F_in, F_out]) + packed vecs.
    wmats = np.zeros((nb, 3, f, f), np.float32)
    vecs = np.zeros((nb, 8, f), np.float32)
    for b, p in enumerate(block_params):
        wmats[b, 0] = np.asarray(p["wp"]).T
        wmats[b, 1] = np.asarray(p["wg"]).T
        wmats[b, 2] = np.asarray(p["wt"]).T
        for r, name in enumerate(("bp", "bg", "bt", "gamma", "beta")):
            vecs[b, r] = np.asarray(p[name]).reshape(-1)

    x_pad = np.zeros((n_pad, f), np.float32)
    x_pad[:n0, :] = np.asarray(x)

    out = pl.pallas_call(
        stgp_fused_kernel,
        out_shape=jax.ShapeDtypeStruct((n_pad, f), jnp.float32),
        grid_spec=pltpu.PrefetchScalarGridSpec(
            num_scalar_prefetch=0,
            grid=(nb,),
            in_specs=[
                pl.BlockSpec((n_pad, f), lambda b: (0, 0)),              # x0
                pl.BlockSpec((1, 2, n_pad, n_pad), lambda b: (b, 0, 0, 0)),  # sel|adj
                pl.BlockSpec((1, n_pad, 2), lambda b: (b, 0, 0)),        # mask rows
                pl.BlockSpec((1, 3, f, f), lambda b: (b, 0, 0, 0)),      # weights
                pl.BlockSpec((1, 8, f), lambda b: (b, 0, 0)),            # vectors
            ],
            out_specs=pl.BlockSpec((n_pad, f), lambda b: (0, 0)),        # resident
        ),
        compiler_params=pltpu.CompilerParams(
            dimension_semantics=("arbitrary",)),
    )(jnp.asarray(x_pad),
      jnp.asarray(gas),
      jnp.asarray(mrows),
      jnp.asarray(wmats, dtype=weight_dtype),
      jnp.asarray(vecs))

    return out[:n_last, :]


# ---------------------------------------------------------------------------
# Deterministic synthetic "graph pyramid" (host-side glue).
# downsample() keeps every other node of the CURRENT graph and returns
# (indices into the current feature matrix, induced adjacency in that order),
# matching x[downsampled_nodes] + nx.to_numpy_array(downsampled_graph).
# ---------------------------------------------------------------------------
class GraphPyramid:
    def __init__(self, num_nodes, seed=0):
        self.num_nodes = num_nodes
        rng = np.random.RandomState(seed)
        a = (rng.rand(num_nodes, num_nodes) > 0.5).astype(np.float32)
        a = np.maximum(a, a.T)
        np.fill_diagonal(a, 0.0)
        self.base_adj = a
        self.current = np.arange(num_nodes)

    def reset(self):
        self.current = np.arange(self.num_nodes)

    def downsample(self):
        local_idx = np.arange(0, len(self.current), 2)  # indices into current x
        self.current = self.current[local_idx]
        adj = self.base_adj[np.ix_(self.current, self.current)]
        return local_idx, adj


# ---------------------------------------------------------------------------
# Parameter init (mimics module shapes) + pure-JAX reference.
# ---------------------------------------------------------------------------
def init_block_params(key, f):
    ks = jax.random.split(key, 6)
    scale = 1.0 / np.sqrt(f)
    return {
        "wp": jax.random.uniform(ks[0], (f, f), jnp.float32, -scale, scale),
        "bp": jax.random.uniform(ks[1], (1, f), jnp.float32, -scale, scale),
        "wg": jax.random.uniform(ks[2], (f, f), jnp.float32, -scale, scale),
        "bg": jax.random.uniform(ks[3], (1, f), jnp.float32, -scale, scale),
        "wt": jax.random.uniform(ks[4], (f, f), jnp.float32, -scale, scale),
        "bt": jax.random.uniform(ks[5], (1, f), jnp.float32, -scale, scale),
        "gamma": jnp.ones((1, f), jnp.float32),
        "beta": jnp.zeros((1, f), jnp.float32),
    }


def ref_block(x, adj, p, mm_dtype=jnp.float32):
    # mm_dtype mirrors the kernel's MXU dtype for the three Linear matmuls;
    # adjacency matmul and BN stay f32, exactly as in the kernel.
    def lin(a, w, b):
        return jnp.dot(a.astype(mm_dtype), w.T.astype(mm_dtype),
                       preferred_element_type=jnp.float32) + b
    x_proj = lin(x, p["wp"], p["bp"])
    h = jnp.dot(adj, x_proj, preferred_element_type=jnp.float32)
    h = jnp.maximum(lin(h, p["wg"], p["bg"]), 0.0)
    y = lin(h, p["wt"], p["bt"])
    mean = jnp.mean(y, axis=0, keepdims=True)
    var = jnp.mean((y - mean) ** 2, axis=0, keepdims=True)
    y = (y - mean) / jnp.sqrt(var + BN_EPS) * p["gamma"] + p["beta"]
    return y + x_proj


if __name__ == "__main__":
    NUM_BLOCKS = 2
    NUM_NODES = 16          # base graph size
    FEATURES = 32           # in_features == out_features (required by module)

    key = jax.random.PRNGKey(0)
    kx, kp = jax.random.split(key)
    x0 = jax.random.normal(kx, (NUM_NODES, FEATURES), jnp.float32)

    block_keys = jax.random.split(kp, NUM_BLOCKS)
    block_params = [init_block_params(block_keys[i], FEATURES)
                    for i in range(NUM_BLOCKS)]

    pyramid = GraphPyramid(NUM_NODES, seed=0)

    def run_reference(mm_dtype):
        pyramid.reset()
        xr = x0
        for p in block_params:
            idx, adj_np = pyramid.downsample()
            xr = xr[jnp.asarray(idx, dtype=jnp.int32)]
            xr = ref_block(xr, jnp.asarray(adj_np, jnp.float32), p, mm_dtype)
        return np.asarray(jax.block_until_ready(xr))

    ref_f32 = run_reference(jnp.float32)
    ref_bf16 = run_reference(jnp.bfloat16)

    # f32-weight path: exact module semantics, tight tolerance.
    out_f32 = jax.block_until_ready(
        stgp_network_forward(x0, block_params, pyramid,
                             weight_dtype=jnp.float32))
    np.testing.assert_allclose(np.asarray(out_f32), ref_f32,
                               rtol=1e-3, atol=1e-3)

    # bf16-weight MXU path (v6e/v7x-friendly): checked against a reference
    # with matching matmul precision.
    out_bf16 = jax.block_until_ready(
        stgp_network_forward(x0, block_params, pyramid,
                             weight_dtype=jnp.bfloat16))
    np.testing.assert_allclose(np.asarray(out_bf16), ref_bf16,
                               rtol=1e-2, atol=1e-2)

    print("KERNEL_OK")
</pallas_src>

<mosaic_0001>
module attributes {stable_mosaic.version = 11 : i64} {
  func.func @stgp_fused_kernel(%arg0: i32, %arg1: memref<16x32xf32, #tpu.memory_space<vmem>>, %arg2: memref<1x2x16x16xf32, #tpu.memory_space<vmem>>, %arg3: memref<1x16x2xf32, #tpu.memory_space<vmem>>, %arg4: memref<1x3x32x32xf32, #tpu.memory_space<vmem>>, %arg5: memref<1x8x32xf32, #tpu.memory_space<vmem>>, %arg6: memref<16x32xf32, #tpu.memory_space<vmem>>) attributes {dimension_semantics = [#tpu.dimension_semantics<arbitrary>], iteration_bounds = array<i64: 2>, scalar_prefetch = 0 : i64, scratch_operands = 0 : i64, tpu.core_type = #tpu.core_type<tc>, window_params = [{pipeline_mode = #tpu.pipeline_mode<synchronous>, transform_indices = @transform_0, window_bounds = array<i64: 16, 32>}, {transform_indices = @transform_1, window_bounds = array<i64: 1, 2, 16, 16>}, {transform_indices = @transform_2, window_bounds = array<i64: 1, 16, 2>}, {transform_indices = @transform_3, window_bounds = array<i64: 1, 3, 32, 32>}, {transform_indices = @transform_4, window_bounds = array<i64: 1, 8, 32>}, {pipeline_mode = #tpu.pipeline_mode<synchronous>, transform_indices = @transform_5, window_bounds = array<i64: 16, 32>}]} {
    %c0_i32 = arith.constant 0 : i32
    %0 = arith.cmpi eq, %arg0, %c0_i32 : i32
    %1 = arith.extui %0 : i1 to i32
    %c0_i32_0 = arith.constant 0 : i32
    %2 = arith.cmpi ne, %1, %c0_i32_0 : i32
    scf.if %2 {
      %c0_27 = arith.constant 0 : index
      %c0_28 = arith.constant 0 : index
      %70 = vector.load %arg1[%c0_27, %c0_28] : memref<16x32xf32, #tpu.memory_space<vmem>>, vector<16x32xf32>
      %c0_29 = arith.constant 0 : index
      %c0_30 = arith.constant 0 : index
      %71 = vector.load %arg6[%c0_29, %c0_30] : memref<16x32xf32, #tpu.memory_space<vmem>>, vector<16x32xf32>
      tpu.vector_store %arg6[%c0_29, %c0_30], %70 {strides = array<i32>} : memref<16x32xf32, #tpu.memory_space<vmem>>, vector<16x32xf32>,
    } else {
    }
    %c0 = arith.constant 0 : index
    %c0_1 = arith.constant 0 : index
    %c0_2 = arith.constant 0 : index
    %c0_3 = arith.constant 0 : index
    %3 = vector.load %arg2[%c0, %c0_1, %c0_2, %c0_3] : memref<1x2x16x16xf32, #tpu.memory_space<vmem>>, vector<1x2x16x16xf32>
    %4 = vector.shape_cast %3 : vector<1x2x16x16xf32> to vector<2x16x16xf32>
    %5 = vector.extract_strided_slice %4 {offsets = [0, 0, 0], sizes = [1, 16, 16], strides = [1, 1, 1]} : vector<2x16x16xf32> to vector<1x16x16xf32>
    %6 = vector.shape_cast %5 : vector<1x16x16xf32> to vector<16x16xf32>
    %7 = vector.extract_strided_slice %4 {offsets = [1, 0, 0], sizes = [1, 16, 16], strides = [1, 1, 1]} : vector<2x16x16xf32> to vector<1x16x16xf32>
    %8 = vector.shape_cast %7 : vector<1x16x16xf32> to vector<16x16xf32>
    %c0_4 = arith.constant 0 : index
    %c0_5 = arith.constant 0 : index
    %c0_6 = arith.constant 0 : index
    %9 = vector.load %arg3[%c0_4, %c0_5, %c0_6] : memref<1x16x2xf32, #tpu.memory_space<vmem>>, vector<1x16x2xf32>
    %10 = vector.shape_cast %9 : vector<1x16x2xf32> to vector<16x2xf32>
    %11 = vector.extract_strided_slice %10 {offsets = [0, 0], sizes = [16, 1], strides = [1, 1]} : vector<16x2xf32> to vector<16x1xf32>
    %12 = vector.extract_strided_slice %10 {offsets = [0, 1], sizes = [16, 1], strides = [1, 1]} : vector<16x2xf32> to vector<16x1xf32>
    %c0_7 = arith.constant 0 : index
    %c0_8 = arith.constant 0 : index
    %c0_9 = arith.constant 0 : index
    %c0_10 = arith.constant 0 : index
    %13 = vector.load %arg4[%c0_7, %c0_8, %c0_9, %c0_10] : memref<1x3x32x32xf32, #tpu.memory_space<vmem>>, vector<1x3x32x32xf32>
    %14 = vector.shape_cast %13 : vector<1x3x32x32xf32> to vector<3x32x32xf32>
    %c0_11 = arith.constant 0 : index
    %c0_12 = arith.constant 0 : index
    %c0_13 = arith.constant 0 : index
    %15 = vector.load %arg5[%c0_11, %c0_12, %c0_13] : memref<1x8x32xf32, #tpu.memory_space<vmem>>, vector<1x8x32xf32>
    %16 = vector.shape_cast %15 : vector<1x8x32xf32> to vector<8x32xf32>
    %17 = vector.extract_strided_slice %16 {offsets = [0, 0], sizes = [1, 32], strides = [1, 1]} : vector<8x32xf32> to vector<1x32xf32>
    %18 = vector.extract_strided_slice %16 {offsets = [1, 0], sizes = [1, 32], strides = [1, 1]} : vector<8x32xf32> to vector<1x32xf32>
    %19 = vector.extract_strided_slice %16 {offsets = [2, 0], sizes = [1, 32], strides = [1, 1]} : vector<8x32xf32> to vector<1x32xf32>
    %20 = vector.extract_strided_slice %16 {offsets = [3, 0], sizes = [1, 32], strides = [1, 1]} : vector<8x32xf32> to vector<1x32xf32>
    %21 = vector.extract_strided_slice %16 {offsets = [4, 0], sizes = [1, 32], strides = [1, 1]} : vector<8x32xf32> to vector<1x32xf32>
    %c0_14 = arith.constant 0 : index
    %c0_15 = arith.constant 0 : index
    %22 = vector.load %arg6[%c0_14, %c0_15] : memref<16x32xf32, #tpu.memory_space<vmem>>, vector<16x32xf32>
    %cst = arith.constant dense<0.000000e+00> : vector<16x32xf32>
    %23 = tpu.matmul %6, %22, %cst {dimension_numbers = #tpu.dot_dimension_numbers<[1], [0], [0], [1], [0, 0, 1, 1], [], []>} : vector<16x16xf32>, vector<16x32xf32>, vector<16x32xf32> -> vector<16x32xf32>
    %24 = vector.extract_strided_slice %14 {offsets = [0, 0, 0], sizes = [1, 32, 32], strides = [1, 1, 1]} : vector<3x32x32xf32> to vector<1x32x32xf32>
    %25 = vector.shape_cast %24 : vector<1x32x32xf32> to vector<32x32xf32>
    %cst_16 = arith.constant dense<0.000000e+00> : vector<16x32xf32>
    %26 = tpu.matmul %23, %25, %cst_16 {dimension_numbers = #tpu.dot_dimension_numbers<[1], [0], [0], [1], [0, 0, 1, 1], [], []>} : vector<16x32xf32>, vector<32x32xf32>, vector<16x32xf32> -> vector<16x32xf32>
    %27 = vector.broadcast %17 : vector<1x32xf32> to vector<16x32xf32>
    %28 = arith.addf %26, %27 : vector<16x32xf32>
    %cst_17 = arith.constant dense<0.000000e+00> : vector<16x32xf32>
    %29 = tpu.matmul %8, %28, %cst_17 {dimension_numbers = #tpu.dot_dimension_numbers<[1], [0], [0], [1], [0, 0, 1, 1], [], []>} : vector<16x16xf32>, vector<16x32xf32>, vector<16x32xf32> -> vector<16x32xf32>
    %30 = vector.extract_strided_slice %14 {offsets = [1, 0, 0], sizes = [1, 32, 32], strides = [1, 1, 1]} : vector<3x32x32xf32> to vector<1x32x32xf32>
    %31 = vector.shape_cast %30 : vector<1x32x32xf32> to vector<32x32xf32>
    %cst_18 = arith.constant dense<0.000000e+00> : vector<16x32xf32>
    %32 = tpu.matmul %29, %31, %cst_18 {dimension_numbers = #tpu.dot_dimension_numbers<[1], [0], [0], [1], [0, 0, 1, 1], [], []>} : vector<16x32xf32>, vector<32x32xf32>, vector<16x32xf32> -> vector<16x32xf32>
    %33 = vector.broadcast %18 : vector<1x32xf32> to vector<16x32xf32>
    %34 = arith.addf %32, %33 : vector<16x32xf32>
    %cst_19 = arith.constant 0.000000e+00 : f32
    %35 = vector.broadcast %cst_19 : f32 to vector<16x32xf32>
    %36 = arith.maximumf %34, %35 : vector<16x32xf32>
    %37 = vector.extract_strided_slice %14 {offsets = [2, 0, 0], sizes = [1, 32, 32], strides = [1, 1, 1]} : vector<3x32x32xf32> to vector<1x32x32xf32>
    %38 = vector.shape_cast %37 : vector<1x32x32xf32> to vector<32x32xf32>
    %cst_20 = arith.constant dense<0.000000e+00> : vector<16x32xf32>
    %39 = tpu.matmul %36, %38, %cst_20 {dimension_numbers = #tpu.dot_dimension_numbers<[1], [0], [0], [1], [0, 0, 1, 1], [], []>} : vector<16x32xf32>, vector<32x32xf32>, vector<16x32xf32> -> vector<16x32xf32>
    %40 = vector.broadcast %19 : vector<1x32xf32> to vector<16x32xf32>
    %41 = arith.addf %39, %40 : vector<16x32xf32>
    %42 = vector.broadcast %12 : vector<16x1xf32> to vector<16x32xf32>
    %43 = arith.mulf %41, %42 : vector<16x32xf32>
    %cst_21 = arith.constant dense<0.000000e+00> : vector<32xf32>
    %44 = vector.multi_reduction <add>, %43, %cst_21 [0] : vector<16x32xf32> to vector<32xf32>
    %45 = vector.shape_cast %44 : vector<32xf32> to vector<1x32xf32>
    %46 = arith.mulf %41, %41 : vector<16x32xf32>
    %47 = vector.broadcast %12 : vector<16x1xf32> to vector<16x32xf32>
    %48 = arith.mulf %46, %47 : vector<16x32xf32>
    %cst_22 = arith.constant dense<0.000000e+00> : vector<32xf32>
    %49 = vector.multi_reduction <add>, %48, %cst_22 [0] : vector<16x32xf32> to vector<32xf32>
    %50 = vector.shape_cast %49 : vector<32xf32> to vector<1x32xf32>
    %51 = arith.mulf %45, %45 : vector<1x32xf32>
    %52 = arith.subf %50, %51 : vector<1x32xf32>
    %53 = vector.broadcast %45 : vector<1x32xf32> to vector<16x32xf32>
    %54 = arith.subf %41, %53 : vector<16x32xf32>
    %cst_23 = arith.constant 0.000000e+00 : f32
    %55 = vector.broadcast %cst_23 : f32 to vector<1x32xf32>
    %56 = arith.maximumf %52, %55 : vector<1x32xf32>
    %cst_24 = arith.constant 9.99999974E-6 : f32
    %57 = vector.broadcast %cst_24 : f32 to vector<1x32xf32>
    %58 = arith.addf %56, %57 : vector<1x32xf32>
    %59 = math.rsqrt %58 : vector<1x32xf32>
    %60 = vector.broadcast %59 : vector<1x32xf32> to vector<16x32xf32>
    %61 = arith.mulf %54, %60 : vector<16x32xf32>
    %62 = vector.broadcast %20 : vector<1x32xf32> to vector<16x32xf32>
    %63 = arith.mulf %61, %62 : vector<16x32xf32>
    %64 = vector.broadcast %21 : vector<1x32xf32> to vector<16x32xf32>
    %65 = arith.addf %63, %64 : vector<16x32xf32>
    %66 = arith.addf %65, %28 : vector<16x32xf32>
    %67 = vector.broadcast %11 : vector<16x1xf32> to vector<16x32xf32>
    %68 = arith.mulf %66, %67 : vector<16x32xf32>
    %c0_25 = arith.constant 0 : index
    %c0_26 = arith.constant 0 : index
    %69 = vector.load %arg6[%c0_25, %c0_26] : memref<16x32xf32, #tpu.memory_space<vmem>>, vector<16x32xf32>
    tpu.vector_store %arg6[%c0_25, %c0_26], %68 {strides = array<i32>} : memref<16x32xf32, #tpu.memory_space<vmem>>, vector<16x32xf32>,
    return
  }
  func.func @transform_0(%arg0: i32) -> (i32, i32) {
    %c0_i32 = arith.constant 0 : i32
    %c0_i32_0 = arith.constant 0 : i32
    %c0_i32_1 = arith.constant 0 : i32
    return %c0_i32, %c0_i32_0 : i32, i32
  }
  func.func @transform_1(%arg0: i32) -> (i32, i32, i32, i32) {
    %c0_i32 = arith.constant 0 : i32
    %c0_i32_0 = arith.constant 0 : i32
    %c0_i32_1 = arith.constant 0 : i32
    %c0_i32_2 = arith.constant 0 : i32
    return %arg0, %c0_i32, %c0_i32_0, %c0_i32_1 : i32, i32, i32, i32
  }
  func.func @transform_2(%arg0: i32) -> (i32, i32, i32) {
    %c0_i32 = arith.constant 0 : i32
    %c0_i32_0 = arith.constant 0 : i32
    %c0_i32_1 = arith.constant 0 : i32
    return %arg0, %c0_i32, %c0_i32_0 : i32, i32, i32
  }
  func.func @transform_3(%arg0: i32) -> (i32, i32, i32, i32) {
    %c0_i32 = arith.constant 0 : i32
    %c0_i32_0 = arith.constant 0 : i32
    %c0_i32_1 = arith.constant 0 : i32
    %c0_i32_2 = arith.constant 0 : i32
    return %arg0, %c0_i32, %c0_i32_0, %c0_i32_1 : i32, i32, i32, i32
  }
  func.func @transform_4(%arg0: i32) -> (i32, i32, i32) {
    %c0_i32 = arith.constant 0 : i32
    %c0_i32_0 = arith.constant 0 : i32
    %c0_i32_1 = arith.constant 0 : i32
    return %arg0, %c0_i32, %c0_i32_0 : i32, i32, i32
  }
  func.func @transform_5(%arg0: i32) -> (i32, i32) {
    %c0_i32 = arith.constant 0 : i32
    %c0_i32_0 = arith.constant 0 : i32
    %c0_i32_1 = arith.constant 0 : i32
    return %c0_i32, %c0_i32_0 : i32, i32
  }
}

</mosaic_0001>

<bundles_post_ra>
// kernel: tpu_custom_call.1
= control target key start
LH: loop header
LB: loop body
LE: loop exit
PB: predicated region body
PF: predicated region fallthrough
CT: control target
= control target key end

     0   :  { %10 = vsyncpa [#allocation3], 0  ;;  %s1143_s0 = inlined_call_operand.vmem [shape: f32[16,32], index: 0, kind: input, shape index: {}]   ;;  %s1144_s1 = inlined_call_operand.hbm [shape: f32[2,2,16,16], index: 1, kind: input, shape index: {}]   ;;  %s1145_s2 = inlined_call_operand.vmem [shape: f32[2,16,2], index: 2, kind: input, shape index: {}]   ;;  %s1146_s3 = inlined_call_operand.hbm [shape: f32[2,3,32,32], index: 3, kind: input, shape index: {}]   ;;  %s1147_s4 = inlined_call_operand.vmem [shape: f32[2,8,32], index: 4, kind: input, shape index: {}]   ;;  %s1148_s5 = inlined_call_operand.hbm [shape: f32[16,32], index: 5, kind: output, shape index: {}]  }
   0x1   :  { %12 = vsyncpa [#allocation3 + $0x1], 0 }
   0x2   :  { %13 = vsyncpa [#allocation6], 0 }
   0x3   :  { %15 = vsyncpa [#allocation6 + $0x1], 0 }
   0x4   :  { %16 = vsyncpa [#allocation4], 0  ;;  %s939_s18 = smov 0   ;;  %s941_s19 = smov 0  }
   0x5   :  { %s943_s20 = smov 0   ;;  %s945_s21 = smov 0  }
   0x6 LB: > { %s958_s22 = sadd.s32 4294967295, %s900_s21   ;;  %s961_s23 = sadd.s32 1, %s900_s21   ;;  %s900_s21 = sphi %s945_s21, %s1156_s21   ;;  %s896_s20 = sphi %s943_s20, %s1155_s20   ;;  %s892_s19 = sphi %s941_s19, %s1154_s19   ;;  %s888_s18 = sphi %s939_s18, %s1153_s18  }
   0x7   : > { %s47_s24 = ssub.s32 %s900_s21, %s961_s23  ;;  %s50_s25 = sadd.s32 1, %s896_s20 }
   0x8   : > { %p48_p0 = scmp.eq.s32.totalorder %s47_s24, 0  ;;  %p57_p1 = scmp.ne.s32.totalorder %s896_s20, %s892_s19 }
   0x9   : > { %p58_p2 = scmp.eq.s32.totalorder %s900_s21, 0  ;;  %p63_p3 = scmp.ne.s32.totalorder %s892_s19, %s888_s18 }
   0xa   : > { %s971_s26 = scalar_select %p48_p0, %s896_s20, %s50_s25  }
   0xb   : > { %p973_p4 = por %p58_p2, %p57_p1  ;;  %p64_p5 = scmp.eq.s32.totalorder %s958_s22, 0 }
   0xc   : > { %p723_p6 = scmp.lt.s32.totalorder %s900_s21, 2  ;;  %s984_s29 = sand.u32 1, %s896_s20  }
   0xd   : > { %p979_p7 = por %p64_p5, %p63_p3  ;;  %s677_s30 = sshll.u32 %s984_s29, 5 }
   0xe   : > { %s701_s6 = sshll.u32 %s900_s21, 5  ;;  %s193_s10 = scalar_lea.vmem [#allocation2], %s677_s30 }
   0xf   : > { %s198_s9 = scalar_lea.hbm %s1144_s1, %s701_s6  ;;  %s201_s11 = sshll.u32 %s193_s10, 4  ;;  %s202_s11 = int_to_ptr.vmem [resolvable:$true] %s201_s11 }
  0x10   : > { %s199_s12 = sshll.u32 %s198_s9, 4  ;;  %p993_p8 = pnand %p723_p6, %p973_p4  ;;  %s200_s12 = int_to_ptr.hbm [resolvable:$true] %s199_s12 }
  0x11   : > { %p681_p9 = scmp.ge.s32.totalorder %s900_s21, 1  ;;  %s190_s14 = scalar_lea.sflag [#allocation3], %s984_s29 }
  0x12   : > { %s770_s15 = sshra.s32 %s200_s12, 4  ;;  %p774_p11 = pneg %p993_p8  ;;  %s771_s15 = int_to_ptr.hbm [resolvable:$true] %s770_s15 }
  0x13   : > { %s772_s16 = scalar_lea.hbm %s771_s15, 32  ;;  %s777_s24 = scalar_lea.hbm %s1144_s1, 64 }
  0x14   : > { %p773_p10 = scmp.ne.s32.totalorder %s771_s15, %s772_s16  ;;  %p778_p0 = scmp.lt.s32.totalorder %s771_s15, %s1144_s1 }
  0x15   : > { %p779_p1 = scmp.lt.s32.totalorder %s777_s24, %s772_s16 }
  0x16   : > { %p775_p12 = pnand %p774_p11, %p773_p10 }
  0x17   : > { %p780_p2 = por %p779_p1, %p778_p0 }
  0x18   : > { %p776_p13 = pneg %p775_p12 }
  0x1a   : > { %p781_p3 = pnand %p780_p2, %p776_p13 }
  0x1c   : > { %784 = shalt.err (!%p781_p3)
}
  0x1d   : > { %s902_s30 = smov 128   ;;  %s903_s6 = smov 8  }
  0x1e   : > { %719 = dma.hbm_to_vmem [thread:$0]  (!%p993_p8), %s200_s12, 512, %s202_s11, %s190_s14, %s902_s30, %s902_s30, %s903_s6  }
  0x1f   : > { %p246_p4 = scmp.lt.s32.totalorder %s900_s21, 3  ;;  %s705_s7 = smul.u32 96, %s984_s29 }
  0x20   : > { %s706_s9 = smul.u32 96, %s900_s21  ;;  %s220_s25 = scalar_lea.sflag [#allocation6], %s984_s29 }
  0x21   : > { %p1019_p5 = pnand %p681_p9, %p246_p4  ;;  %s223_s17 = scalar_lea.vmem [#allocation5], %s705_s7 }
  0x22   : > { %s228_s16 = scalar_lea.hbm %s1146_s3, %s706_s9  ;;  %s231_s18 = sshll.u32 %s223_s17, 4  ;;  %s232_s18 = int_to_ptr.vmem [resolvable:$true] %s231_s18 }
  0x23   : > { %s229_s24 = sshll.u32 %s228_s16, 4  ;;  %s807_s27 = scalar_lea.hbm %s1146_s3, 192  ;;  %s230_s24 = int_to_ptr.hbm [resolvable:$true] %s229_s24 }
  0x24   : > { %s800_s11 = sshra.s32 %s230_s24, 4  ;;  %s801_s11 = int_to_ptr.hbm [resolvable:$true] %s800_s11 }
  0x25   : > { %s802_s12 = scalar_lea.hbm %s801_s11, 96  ;;  %p808_p12 = scmp.lt.s32.totalorder %s801_s11, %s1146_s3 }
  0x26   : > { %p803_p6 = scmp.ne.s32.totalorder %s801_s11, %s802_s12  ;;  %p809_p13 = scmp.lt.s32.totalorder %s807_s27, %s802_s12 }
  0x28   : > { %p805_p9 = pnand %p803_p6, %p774_p11  ;;  %p810_p0 = por %p809_p13, %p808_p12 }
  0x2a   : > { %p806_p10 = pneg %p805_p9 }
  0x2c   : > { %p811_p1 = pnand %p810_p0, %p806_p10 }
  0x2e   : > { %814 = shalt.err (!%p811_p1)
}
  0x2f   : > { %722 = dma.hbm_to_vmem [thread:$0]  (!%p993_p8), %s230_s24, 1536, %s232_s18, %s220_s25, %s902_s30, %s902_s30, %s903_s6  }
  0x30   : > { %250 = sbr.rel (%p1019_p5) target bundleno = 806 (0x326), region = 40  ;;  %s252_s29 = sand.u32 (!%p1019_p5), 1, %s892_s19  }
  0x31   : > { %s682_s7 = sshll.u32 (!%p1019_p5), %s252_s29, 5  ;;  %s253_s15 = scalar_lea.sflag (!%p1019_p5), [#allocation3], %s252_s29 }
  0x32   : > { %s1045_s16 = scalar_lea.vmem (!%p1019_p5), [#allocation2], %s682_s7 }
  0x35   : > { %875 = dma.done.wait (%p979_p7), %s253_s15, 512  }
  0x36   : > { %877 = vsyncadd (%p979_p7), %s253_s15, 4294966784  ;;  %s707_s13 = smul.u32 96, %s252_s29  ;;  %s263_s17 = scalar_lea.sflag [#allocation6], %s252_s29 }
  0x38   : > { %s1051_s11 = scalar_lea.vmem [#allocation5], %s707_s13 }
  0x39   : > { %879 = dma.done.wait (%p979_p7), %s263_s17, 1536  }
  0x3a   : > { %881 = vsyncadd (%p979_p7), %s263_s17, 4294965760  ;;  %p303_p8 = scmp.lt.s32.totalorder %s958_s22, 1  ;;  %p686_p11 = scmp.ne.s32.totalorder %s958_s22, 0 }
  0x3c   : > { %s304_s30 = scalar_select %p303_p8, %s958_s22, 1 }
  0x3d   : > { %315 = sbr.rel (%p686_p11) target bundleno = 69 (0x45), region = 52 }
  0x3e   : > { %s702_s6 = sshll.u32 %s304_s30, 4  ;;  %s685_s8 = sshll.u32 %s304_s30, 3 }
  0x3f   : > { %s1062_s25 = scalar_lea.vmem %s1145_s2, %s702_s6  ;;  %s1067_s21 = scalar_lea.vmem %s1147_s4, %s685_s8 }
  0x42   : > { %v316_v0 = vld [vmem:[%s1143_s0] sm:$0xff]  ;;  %vm318_vm0 = vcmask 261120   ;;  %v317_v1 = vld [vmem:[%s1143_s0 + $0x8] sm:$0xff] }
  0x43   : > { %319 = vst.msk [vmem:[#allocation7] sm:$0xff] %vm318_vm0, %v316_v0 }
  0x44   : > { %320 = vst.msk [vmem:[#allocation7 + $0x8] sm:$0xff] %vm318_vm0, %v317_v1 }
  0x45 PF: > { %v321_v4 = vld [vmem:[%s1045_s16] sm:$0xff]  ;;  %vm342_vm1 = vcmask 130048   ;;  %v322_v5 = vld [vmem:[%s1045_s16 + $0x8] sm:$0xff]  ;;  %v330_v6 = vld [vmem:[%s1051_s11 + $0x18] sm:$0xff]  ;;  %vm373_vm2 = vcmask 261120   ;;  %v904_v30 = vmov 1  }
  0x46   : > { %392 = vmatpush.msra.mxu1 %v330_v6  ;;  %v329_v7 = vld [vmem:[%s1051_s11 + $0x10] sm:$0xff]  ;;  %v328_v8 = vld [vmem:[%s1051_s11 + $0x8] sm:$0xff]  ;;  %v327_v9 = vld [vmem:[%s1051_s11] sm:$0xff]  ;;  %765 = vset.pattern.permute.xlu0 %v904_v30  ;;  %v905_v32 = vmov 0   ;;  %s906_s29 = smov [#allocation7]   ;;  %s573_s13 = sshll.u32 %s1148_s5, 4  ;;  %s574_s13 = int_to_ptr.hbm [resolvable:$true] %s573_s13 }
  0x47   : > { %v334_v12 = vld [vmem:[%s1051_s11 + $0x38] sm:$0xff]  ;;  %v333_v13 = vld [vmem:[%s1051_s11 + $0x30] sm:$0xff]  ;;  %v332_v14 = vld [vmem:[%s1051_s11 + $0x28] sm:$0xff]  ;;  %766 = vset.pattern.permute.xlu1 %v905_v32  ;;  %s571_s7 = sshll.u32 %s906_s29, 4  ;;  %p724_p7 = scmp.eq.s32.totalorder %s958_s22, 1  ;;  %s572_s7 = int_to_ptr.vmem [resolvable:$true] %s571_s7 }
  0x48   : > { %393 = vmatpush.msra.mxu1 %v329_v7  ;;  %451 = vmatpush.msra.mxu3 %v334_v12  ;;  %v1090_v16 = vld [vmem:[%s1067_s21] sm:$0xff]  ;;  %v323_v21 = vld [vmem:[%s1045_s16 + $0x10] sm:$0xff]  ;;  %v324_v22 = vld [vmem:[%s1045_s16 + $0x18] sm:$0xff]  ;;  %s907_s17 = smov 128  }
  0x49   : > { %v372_v17 = vperm.slane %v1090_v16, 0  ;;  %v331_v23 = vld [vmem:[%s1051_s11 + $0x20] sm:$0xff]  ;;  %v338_v24 = vld [vmem:[%s1051_s11 + $0x58] sm:$0xff]  ;;  %v337_v27 = vld [vmem:[%s1051_s11 + $0x50] sm:$0xff]  ;;  %v432_v34 = vperm.slane %v1090_v16, 1  ;;  %v464_v41 = vperm.slane %v1090_v16, 2 }
  0x4a   : > { %v340_v3 = vld [vmem:[#allocation7] sm:$0xff]  ;;  %394 = vmatpush.msra.mxu1 %v328_v8  ;;  %452 = vmatpush.msra.mxu3 %v333_v13  ;;  %v336_v28 = vld [vmem:[%s1051_s11 + $0x48] sm:$0xff] }
  0x4b   : > { %v341_v2 = vld [vmem:[#allocation7 + $0x8] sm:$0xff]  ;;  %v335_v29 = vld [vmem:[%s1051_s11 + $0x40] sm:$0xff]  ;;  %s908_s11 = smov 8  }
  0x4c   : > { %363 = vmatpush.msra.mxu0 %v341_v2  ;;  %703 = vmatpush.msra.mxu2 %v341_v2  ;;  %v325_v31 = vld [vmem:[%s1062_s25] sm:$0xff]  ;;  %v326_v33 = vld [vmem:[%s1062_s25 + $0x8] sm:$0xff] }
  0x4d   : > { %395 = vmatpush.msra.mxu1 %v327_v9  ;;  %453 = vmatpush.msra.mxu3 %v332_v14 }
  0x4e   : > { %364 = vmatpush.msra.mxu0 %v340_v3  ;;  %704 = vmatpush.msra.mxu2 %v340_v3 }
  0x4f   : > { %687 = vmatmul.msk.f32.vlgmr.msra.gmra.mxu0 %vm342_vm1, %v321_v4  ;;  %688 = vmatmul.msk.f32.vlgmr.msra.gmra.mxu2 %vm342_vm1, %v322_v5 }
  0x50   : > { %454 = vmatpush.msra.mxu3 %v331_v23  ;;  %483 = vmatpush.msrb.mxu0 %v338_v24  ;;  %v546_v23 = vperm.slane %v1090_v16, 3 }
  0x51   : > { %496 = vperm.xlu0 %765, %v325_v31   ;;  %555 = vperm.xlu1 %766, %v325_v31  }
  0x52   : > { %484 = vmatpush.msrb.mxu0 %v337_v27  ;;  %v549_v27 = vperm.slane %v1090_v16, 4 }
  0x54   : > { %485 = vmatpush.msrb.mxu0 %v336_v28 }
  0x56   : > { %486 = vmatpush.msrb.mxu0 %v335_v29 }
  0x59   : > { %501 = vperm.xlu0 %765, %v326_v33   ;;  %559 = vperm.xlu1 %766, %v326_v33  }
  0x61   : > { %767 = vset.pattern.permute.xlu0 %v905_v32 }
  0xc3   : > { %v497_v42 = vpop.permute.xlu0 %496 }
  0xcb   : > { %v502_v49 = vpop.permute.xlu0 %501 }
  0xcc   : > { %v366_v10 = vpop.f32.mrf.mxu0 }
  0xcd   : > { %689 = vmatmul.msk.f32.vlgmr.msra.gmra.mxu1 %vm373_vm2, %v366_v10 }
  0xd2   : > { %v369_v11 = vpop.f32.mrf.mxu2 }
  0xd5   : > { %690 = vmatmul.msk.f32.gmra.mxu1 %vm373_vm2, %v369_v11 }
 0x14a   : > { %v397_v15 = vpop.f32.mrf.mxu1 }
 0x14b   : > { %v1095_v20 = vadd.f32 %v397_v15, %v372_v17 }
 0x152   : > { %v400_v18 = vpop.f32.mrf.mxu1 }
 0x153   : > { %v1093_v19 = vadd.f32 %v400_v18, %v372_v17 }
 0x155   : > { %423 = vmatpush.msrb.mxu2 %v1093_v19 }
 0x157   : > { %424 = vmatpush.msrb.mxu2 %v1095_v20 }
 0x158   : > { %691 = vmatmul.msk.f32.vlgmr.msrb.gmra.mxu2 %vm342_vm1, %v323_v21  ;;  %v556_v21 = vpop.permute.xlu1 %555 }
 0x160   : > { %692 = vmatmul.msk.f32.gmra.mxu2 %vm342_vm1, %v324_v22 }
 0x1db   : > { %v426_v25 = vpop.f32.mrf.mxu2 }
 0x1dc   : > { %693 = vmatmul.msk.f32.vlgmr.msra.gmra.mxu3 %vm373_vm2, %v426_v25 }
 0x1e3   : > { %v429_v26 = vpop.f32.mrf.mxu2 }
 0x1e4   : > { %694 = vmatmul.msk.f32.gmra.mxu3 %vm373_vm2, %v429_v26 }
 0x25f   : > { %v456_v35 = vpop.f32.mrf.mxu3 }
 0x260   : > { %v457_v36 = vadd.f32 %v456_v35, %v432_v34  ;;  %v560_v35 = vpop.permute.xlu1 %559 }
 0x262   : > { %v462_v37 = vmax.f32 %v457_v36, 0.0 }
 0x264   : > { %695 = vmatmul.msk.f32.vlgmr.msrb.gmra.mxu0 %vm373_vm2, %v462_v37 }
 0x267   : > { %v459_v38 = vpop.f32.mrf.mxu3 }
 0x268   : > { %v460_v39 = vadd.f32 %v459_v38, %v432_v34 }
 0x26a   : > { %v463_v40 = vmax.f32 %v460_v39, 0.0 }
 0x26c   : > { %696 = vmatmul.msk.f32.gmra.mxu0 %vm373_vm2, %v463_v40 }
 0x2e1   : > { %v488_v43 = vpop.f32.mrf.mxu0 }
 0x2e2   : > { %v489_v44 = vadd.f32 %v488_v43, %v464_v41 }
 0x2e4   : > { %v515_v45 = vmul.f32 %v489_v44, %v489_v44  ;;  %v504_v47 = vmul.f32 %v497_v42, %v489_v44 }
 0x2e6   : > { %v517_v50 = vmul.f32 %v515_v45, %v497_v42  ;;  %v506_v53 = vsel %vm373_vm2, %v504_v47, 0.0 }
 0x2e8   : > { %v519_v57 = vsel %vm373_vm2, %v517_v50, 0.0 }
 0x2e9   : > { %v491_v46 = vpop.f32.mrf.mxu0 }
 0x2ea   : > { %v492_v48 = vadd.f32 %v491_v46, %v464_v41 }
 0x2ec   : > { %v505_v51 = vmul.f32 %v502_v49, %v492_v48  ;;  %v516_v52 = vmul.f32 %v492_v48, %v492_v48 }
 0x2ee   : > { %v507_v54 = vsel %vm373_vm2, %v505_v51, 0.0  ;;  %v518_v55 = vmul.f32 %v516_v52, %v502_v49 }
 0x2ef   : > { %v508_v56 = vadd.f32 %v507_v54, %v506_v53 }
 0x2f0   : > { %v520_v58 = vsel %vm373_vm2, %v518_v55, 0.0 }
 0x2f1   : > { %v509_v59 = vrot.slane %v508_v56, 4  ;;  %v521_v60 = vadd.f32 %v520_v58, %v519_v57 }
 0x2f3   : > { %v510_v61 = vadd.f32 %v509_v59, %v508_v56  ;;  %v522_v62 = vrot.slane %v521_v60, 4 }
 0x2f5   : > { %v511_v63 = vrot.slane %v510_v61, 2  ;;  %v523_v0 = vadd.f32 %v522_v62, %v521_v60 }
 0x2f7   : > { %v512_v1 = vadd.f32 %v511_v63, %v510_v61  ;;  %v524_v2 = vrot.slane %v523_v0, 2 }
 0x2f9   : > { %v513_v3 = vrot.slane %v512_v1, 1  ;;  %v525_v4 = vadd.f32 %v524_v2, %v523_v0 }
 0x2fb   : > { %v514_v5 = vadd.f32 %v513_v3, %v512_v1  ;;  %v526_v6 = vrot.slane %v525_v4, 1 }
 0x2fd   : > { %v527_v7 = vadd.f32 %v526_v6, %v525_v4  ;;  %v528_v8 = vmul.f32 %v514_v5, %v514_v5  ;;  %v531_v22 = vsub.f32 %v492_v48, %v514_v5  ;;  %v530_v24 = vsub.f32 %v489_v44, %v514_v5 }
 0x2ff   : > { %v529_v9 = vsub.f32 %v527_v7, %v528_v8 }
 0x301   : > { %v532_v10 = vmax.f32 %v529_v9, 0.0 }
 0x303   : > { %v533_v11 = vadd.f32 1e-05, %v532_v10 }
 0x305   : > { %768 = vrsqrt.f32 %v533_v11  ;;  %vm540_vm4 = vweird.f32 %v533_v11 }
 0x30b   : > { %v769_v12 = vpop.eup %768 }
 0x30c   : > { %v535_v13 = vmul.f32 %v769_v12, %v533_v11  ;;  %vm541_vm3 = vweird.f32 %v769_v12 }
 0x30d   : > { %vm542_vm5 = vmor %vm540_vm4, %vm541_vm3 }
 0x30e   : > { %v536_v14 = vmul.f32 %v769_v12, %v535_v13 }
 0x310   : > { %v537_v15 = vmul.f32 0.5, %v536_v14 }
 0x312   : > { %v538_v17 = vsub.f32 1.5, %v537_v15 }
 0x314   : > { %v539_v18 = vmul.f32 %v769_v12, %v538_v17 }
 0x316   : > { %v543_v25 = vsel %vm542_vm5, %v769_v12, %v539_v18 }
 0x317   : > { %v545_v26 = vmul.f32 %v543_v25, %v531_v22  ;;  %v544_v28 = vmul.f32 %v543_v25, %v530_v24 }
 0x319   : > { %v547_v29 = vmul.f32 %v546_v23, %v544_v28  ;;  %v548_v30 = vmul.f32 %v546_v23, %v545_v26 }
 0x31b   : > { %v550_v31 = vadd.f32 %v549_v27, %v547_v29  ;;  %v551_v32 = vadd.f32 %v549_v27, %v548_v30 }
 0x31d   : > { %v552_v33 = vadd.f32 %v550_v31, %v1095_v20  ;;  %v553_v34 = vadd.f32 %v551_v32, %v1093_v19 }
 0x31f   : > { %v562_v36 = vmul.f32 %v556_v21, %v552_v33  ;;  %v563_v37 = vmul.f32 %v560_v35, %v553_v34 }
 0x321   : > { %564 = vst.msk [vmem:[#allocation7] sm:$0xff] %vm373_vm2, %v562_v36 }
 0x322   : > { %565 = vst.msk [vmem:[#allocation7 + $0x8] sm:$0xff] %vm373_vm2, %v563_v37 }
 0x323   : > { %713 = dma.vmem_to_hbm [thread:$0]  (%p724_p7), %s572_s7, 256, %s574_s13, [#allocation4], %s907_s17, %s907_s17, %s908_s11  }
 0x324   : > { %883 = dma.done.wait (%p724_p7), [#allocation4], 256  }
 0x325   : > { %885 = vsyncadd (%p724_p7), [#allocation4], 4294967040 }
 0x326 PF: > { %p19_p2 = scmp.ge.s32.totalorder %s961_s23, 4   ;;  %s1153_s18 = smov %s892_s19 }
 0x327   : > { %s1154_s19 = smov %s896_s20  ;;  %s1155_s20 = smov %s971_s26 }
 0x328   : > { %s1156_s21 = smov %s961_s23  ;;  %21 = sbr.rel (!%p19_p2) target bundleno = 6 (0x6), region = 100 }
 0x32d   :  { %590 = vsyncpa [#allocation3], 1 }
 0x32e   :  { %592 = vsyncpa [#allocation3 + $0x1], 1 }
 0x32f   :  { %593 = vsyncpa [#allocation6], 1 }
 0x330   :  { %595 = vsyncpa [#allocation6 + $0x1], 1 }
 0x331   :  { %596 = vsyncpa [#allocation4], 1 }
 0x332   :  { %598 = vsyncpa [#allocation4 + $0x1], 1 }

</bundles_post_ra>
